<compile_context>
chip_gen: v6e
topology: v6e:2x2x1
jax: 0.10.0
libtpu: 0.0.40
codegen_flags: <defaults>
</compile_context>

<pallas_src>
import functools

import jax
import jax.numpy as jnp
from jax.experimental import pallas as pl
from jax.experimental.pallas import tpu as pltpu


# ----------------------------------------------------------------------------
# Fused kernel: BN1 -> ReLU -> Conv1x1 -> BN2 -> ReLU -> Conv3x3 -> concat
# ----------------------------------------------------------------------------
def _bottleneck_kernel(x_ref, s1_ref, t1_ref, w1_ref, s2_ref, t2_ref,
                       w2_ref, b2_ref, ml_ref, mr_ref, o_ref, *, width):
    # x_ref : (1, Cin, HW)    f32 input pixels (NCHW, spatial flattened)
    # s1/t1 : (Cin, 1)        folded BN1 scale / shift
    # w1    : (Cb, Cin)       bf16 1x1-conv weight
    # s2/t2 : (Cb, 1)         folded BN2 scale / shift (conv1 bias folded in)
    # w2    : (9*G, Cb)       bf16 3x3-conv weight, row = (dy*3 + dx)*G + g
    # b2    : (G, 1)          3x3-conv bias
    # ml/mr : (1, HW)         left/right image-border masks (1.0 valid)
    # o_ref : (1, G+Cin, HW)  [conv3x3 output ; passthrough input]
    G = b2_ref.shape[0]
    HW = x_ref.shape[2]
    W = width
    P = W + 1

    x = x_ref[0]                                            # (Cin, HW) f32

    # BN1 + ReLU (f32, VPU)
    xa = jnp.maximum(x * s1_ref[...] + t1_ref[...], 0.0)

    # 1x1 conv as one MXU matmul (bf16 operands, f32 accumulate)
    z = jnp.dot(w1_ref[...], xa.astype(jnp.bfloat16),
                preferred_element_type=jnp.float32)         # (Cb, HW)

    # BN2 (+ folded conv1 bias) + ReLU (f32, VPU)
    z = jnp.maximum(z * s2_ref[...] + t2_ref[...], 0.0)

    # All nine 3x3 taps in ONE contraction: (9G, Cb) @ (Cb, HW) -> (9G, HW)
    y = jnp.dot(w2_ref[...], z.astype(jnp.bfloat16),
                preferred_element_type=jnp.float32)

    # Zero-pad the flat-pixel (lane) axis once; each tap's shifted window is
    # then a plain static lane slice of this slab (no input relayouts).
    zpad = jnp.zeros((y.shape[0], P), jnp.float32)
    ypad = jnp.concatenate([zpad, y, zpad], axis=1)         # (9G, HW + 2P)

    acc = None
    for dy in range(3):
        for dx in range(3):
            k = dy * 3 + dx
            s = (dy - 1) * W + (dx - 1)                     # flat pixel shift
            tap = ypad[k * G:(k + 1) * G, P + s:P + s + HW]  # (G, HW)
            if dx == 0:          # reads column w-1: invalid at w == 0
                tap = tap * ml_ref[...]
            elif dx == 2:        # reads column w+1: invalid at w == W-1
                tap = tap * mr_ref[...]
            acc = tap if acc is None else acc + tap
    acc = acc + b2_ref[...]                                 # conv3x3 bias

    # Fused torch.cat([conv_out, input], dim=1): passthrough the resident x.
    out_tile = jnp.concatenate([acc, x], axis=0)            # (G+Cin, HW)
    o_ref[...] = out_tile[None].astype(o_ref.dtype)


# ----------------------------------------------------------------------------
# Parameter init (matches the PyTorch module's tensors, eval-mode BN stats)
# ----------------------------------------------------------------------------
def init_bottleneck_params(key, in_chan, bottleneck_size, growth_rate):
    btgr = bottleneck_size * growth_rate
    keys = jax.random.split(key, 12)
    p = {}
    # BatchNorm2d(in_chan) -- eval mode (running stats)
    p["bn1_gamma"] = 1.0 + 0.1 * jax.random.normal(keys[0], (in_chan,), jnp.float32)
    p["bn1_beta"] = 0.1 * jax.random.normal(keys[1], (in_chan,), jnp.float32)
    p["bn1_mean"] = 0.1 * jax.random.normal(keys[2], (in_chan,), jnp.float32)
    p["bn1_var"] = 1.0 + 0.1 * jax.random.uniform(keys[3], (in_chan,), jnp.float32)
    # Conv2d(in_chan, btgr, kernel_size=1)
    p["w1"] = 0.1 * jax.random.normal(keys[4], (btgr, in_chan), jnp.float32)    # (Cout, Cin)
    p["b1"] = 0.05 * jax.random.normal(keys[5], (btgr,), jnp.float32)
    # BatchNorm2d(btgr)
    p["bn2_gamma"] = 1.0 + 0.1 * jax.random.normal(keys[6], (btgr,), jnp.float32)
    p["bn2_beta"] = 0.1 * jax.random.normal(keys[7], (btgr,), jnp.float32)
    p["bn2_mean"] = 0.1 * jax.random.normal(keys[8], (btgr,), jnp.float32)
    p["bn2_var"] = 1.0 + 0.1 * jax.random.uniform(keys[9], (btgr,), jnp.float32)
    # Conv2d(btgr, growth_rate, kernel_size=3, padding=1)
    p["w2"] = 0.05 * jax.random.normal(keys[10], (growth_rate, btgr, 3, 3), jnp.float32)
    p["b2"] = 0.05 * jax.random.normal(keys[11], (growth_rate,), jnp.float32)
    return p


def _fold_bn(gamma, beta, mean, var, eps=1e-5):
    scale = gamma * jax.lax.rsqrt(var + eps)
    shift = beta - mean * scale
    return scale, shift


# ----------------------------------------------------------------------------
# Module wrapper
# ----------------------------------------------------------------------------
@jax.jit
def bottleneck_forward(x_nchw, params):
    """x_nchw: (N, Cin, H, W) -> (N, growth_rate + Cin, H, W), NCHW like PyTorch."""
    N, Cin, H, W = x_nchw.shape
    Cb = params["w1"].shape[0]            # bottleneck_size * growth_rate
    G = params["w2"].shape[0]             # growth_rate
    HW = H * W

    # Fold eval-mode BatchNorms; fold the 1x1-conv bias into the BN2 shift:
    #   BN2(W1 x + b1) = s2*(W1 x) + (s2*b1 + t2)
    s1, t1 = _fold_bn(params["bn1_gamma"], params["bn1_beta"],
                      params["bn1_mean"], params["bn1_var"])
    s2, t2 = _fold_bn(params["bn2_gamma"], params["bn2_beta"],
                      params["bn2_mean"], params["bn2_var"])
    t2 = t2 + s2 * params["b1"]

    # bf16 MXU operands (f32 accumulation happens inside the kernel).
    w1 = params["w1"].astype(jnp.bfloat16)                              # (Cb, Cin)
    # (G, Cb, 3, 3) -> (3, 3, G, Cb) -> (9G, Cb); row index = (dy*3 + dx)*G + g
    w2 = jnp.transpose(params["w2"], (2, 3, 0, 1)).reshape(9 * G, Cb)
    w2 = w2.astype(jnp.bfloat16)

    # Left/right image-border masks in flat-pixel (lane) coordinates.
    col = jnp.arange(HW, dtype=jnp.int32) % W
    mask_l = (col >= 1).astype(jnp.float32).reshape(1, HW)
    mask_r = (col <= W - 2).astype(jnp.float32).reshape(1, HW)

    x_flat = x_nchw.reshape(N, Cin, HW)   # free reshape, stays NCHW

    kernel = functools.partial(_bottleneck_kernel, width=W)
    out_flat = pl.pallas_call(
        kernel,
        out_shape=jax.ShapeDtypeStruct((N, G + Cin, HW), jnp.float32),
        grid=(N,),
        in_specs=[
            pl.BlockSpec((1, Cin, HW), lambda n: (n, 0, 0)),     # x
            pl.BlockSpec((Cin, 1), lambda n: (0, 0)),            # bn1 scale
            pl.BlockSpec((Cin, 1), lambda n: (0, 0)),            # bn1 shift
            pl.BlockSpec((Cb, Cin), lambda n: (0, 0)),           # w1 (bf16)
            pl.BlockSpec((Cb, 1), lambda n: (0, 0)),             # bn2 scale
            pl.BlockSpec((Cb, 1), lambda n: (0, 0)),             # bn2 shift (+b1)
            pl.BlockSpec((9 * G, Cb), lambda n: (0, 0)),         # w2 (bf16)
            pl.BlockSpec((G, 1), lambda n: (0, 0)),              # conv3x3 bias
            pl.BlockSpec((1, HW), lambda n: (0, 0)),             # mask_l
            pl.BlockSpec((1, HW), lambda n: (0, 0)),             # mask_r
        ],
        out_specs=pl.BlockSpec((1, G + Cin, HW), lambda n: (n, 0, 0)),
        compiler_params=pltpu.CompilerParams(
            dimension_semantics=("parallel",)),
    )(x_flat,
      s1.reshape(Cin, 1), t1.reshape(Cin, 1), w1,
      s2.reshape(Cb, 1), t2.reshape(Cb, 1), w2,
      params["b2"].reshape(G, 1), mask_l, mask_r)

    return out_flat.reshape(N, G + Cin, H, W)


# ----------------------------------------------------------------------------
# Plain-JAX reference of the PyTorch forward (for a self-check)
# ----------------------------------------------------------------------------
def bottleneck_reference(x, p, eps=1e-5):
    def bn(v, g, b, m, var):
        s = (g / jnp.sqrt(var + eps)).reshape(1, -1, 1, 1)
        return (v - m.reshape(1, -1, 1, 1)) * s + b.reshape(1, -1, 1, 1)

    xa = jax.nn.relu(bn(x, p["bn1_gamma"], p["bn1_beta"],
                        p["bn1_mean"], p["bn1_var"]))
    c1 = jax.lax.conv_general_dilated(
        xa, p["w1"][:, :, None, None], (1, 1), "VALID",
        dimension_numbers=("NCHW", "OIHW", "NCHW"),
        precision=jax.lax.Precision.HIGHEST) + p["b1"].reshape(1, -1, 1, 1)
    za = jax.nn.relu(bn(c1, p["bn2_gamma"], p["bn2_beta"],
                        p["bn2_mean"], p["bn2_var"]))
    c2 = jax.lax.conv_general_dilated(
        za, p["w2"], (1, 1), ((1, 1), (1, 1)),
        dimension_numbers=("NCHW", "OIHW", "NCHW"),
        precision=jax.lax.Precision.HIGHEST) + p["b2"].reshape(1, -1, 1, 1)
    return jnp.concatenate([c2, x], axis=1)


if __name__ == "__main__":
    key = jax.random.PRNGKey(0)
    k_x, k_p = jax.random.split(key)

    # Small shapes consistent with the module: in_chan=4, bottleneck_size=4,
    # growth_rate=8 -> btgr=32; input NCHW = (2, 4, 16, 16).
    in_chan, bottleneck_size, growth_rate = 4, 4, 8
    x = jax.random.normal(k_x, (2, in_chan, 16, 16), jnp.float32)
    params = init_bottleneck_params(k_p, in_chan, bottleneck_size, growth_rate)

    out = jax.block_until_ready(bottleneck_forward(x, params))

    expected_shape = (2, growth_rate + in_chan, 16, 16)
    assert out.shape == expected_shape, (out.shape, expected_shape)
    assert bool(jnp.isfinite(out).all())

    # Numerical self-check vs. plain-JAX reference (loose tol: bf16 MXU ops).
    ref = jax.block_until_ready(bottleneck_reference(x, params))
    max_err = float(jnp.max(jnp.abs(out - ref)))
    assert max_err < 5e-2, f"max abs error vs reference: {max_err}"

    print("KERNEL_OK")
</pallas_src>

<mosaic_0001>
module attributes {stable_mosaic.version = 11 : i64} {
  func.func @_bottleneck_kernel(%arg0: i32, %arg1: memref<1x4x256xf32, #tpu.memory_space<vmem>>, %arg2: memref<4x1xf32, #tpu.memory_space<vmem>>, %arg3: memref<4x1xf32, #tpu.memory_space<vmem>>, %arg4: memref<32x4xbf16, #tpu.memory_space<vmem>>, %arg5: memref<32x1xf32, #tpu.memory_space<vmem>>, %arg6: memref<32x1xf32, #tpu.memory_space<vmem>>, %arg7: memref<72x32xbf16, #tpu.memory_space<vmem>>, %arg8: memref<8x1xf32, #tpu.memory_space<vmem>>, %arg9: memref<1x256xf32, #tpu.memory_space<vmem>>, %arg10: memref<1x256xf32, #tpu.memory_space<vmem>>, %arg11: memref<1x12x256xf32, #tpu.memory_space<vmem>>) attributes {dimension_semantics = [#tpu.dimension_semantics<parallel>], iteration_bounds = array<i64: 2>, scalar_prefetch = 0 : i64, scratch_operands = 0 : i64, tpu.core_type = #tpu.core_type<tc>, window_params = [{transform_indices = @transform_0, window_bounds = array<i64: 1, 4, 256>}, {pipeline_mode = #tpu.pipeline_mode<synchronous>, transform_indices = @transform_1, window_bounds = array<i64: 4, 1>}, {pipeline_mode = #tpu.pipeline_mode<synchronous>, transform_indices = @transform_2, window_bounds = array<i64: 4, 1>}, {pipeline_mode = #tpu.pipeline_mode<synchronous>, transform_indices = @transform_3, window_bounds = array<i64: 32, 4>}, {pipeline_mode = #tpu.pipeline_mode<synchronous>, transform_indices = @transform_4, window_bounds = array<i64: 32, 1>}, {pipeline_mode = #tpu.pipeline_mode<synchronous>, transform_indices = @transform_5, window_bounds = array<i64: 32, 1>}, {pipeline_mode = #tpu.pipeline_mode<synchronous>, transform_indices = @transform_6, window_bounds = array<i64: 72, 32>}, {pipeline_mode = #tpu.pipeline_mode<synchronous>, transform_indices = @transform_7, window_bounds = array<i64: 8, 1>}, {pipeline_mode = #tpu.pipeline_mode<synchronous>, transform_indices = @transform_8, window_bounds = array<i64: 1, 256>}, {pipeline_mode = #tpu.pipeline_mode<synchronous>, transform_indices = @transform_9, window_bounds = array<i64: 1, 256>}, {transform_indices = @transform_10, window_bounds = array<i64: 1, 12, 256>}]} {
    %c0 = arith.constant 0 : index
    %c0_0 = arith.constant 0 : index
    %c0_1 = arith.constant 0 : index
    %0 = vector.load %arg1[%c0, %c0_0, %c0_1] : memref<1x4x256xf32, #tpu.memory_space<vmem>>, vector<1x4x256xf32>
    %1 = vector.shape_cast %0 : vector<1x4x256xf32> to vector<4x256xf32>
    %c0_2 = arith.constant 0 : index
    %c0_3 = arith.constant 0 : index
    %2 = vector.load %arg2[%c0_2, %c0_3] : memref<4x1xf32, #tpu.memory_space<vmem>>, vector<4x1xf32>
    %3 = vector.broadcast %2 : vector<4x1xf32> to vector<4x256xf32>
    %4 = arith.mulf %1, %3 : vector<4x256xf32>
    %c0_4 = arith.constant 0 : index
    %c0_5 = arith.constant 0 : index
    %5 = vector.load %arg3[%c0_4, %c0_5] : memref<4x1xf32, #tpu.memory_space<vmem>>, vector<4x1xf32>
    %6 = vector.broadcast %5 : vector<4x1xf32> to vector<4x256xf32>
    %7 = arith.addf %4, %6 : vector<4x256xf32>
    %cst = arith.constant 0.000000e+00 : f32
    %8 = vector.broadcast %cst : f32 to vector<4x256xf32>
    %9 = arith.maximumf %7, %8 : vector<4x256xf32>
    %c0_6 = arith.constant 0 : index
    %c0_7 = arith.constant 0 : index
    %10 = vector.load %arg4[%c0_6, %c0_7] : memref<32x4xbf16, #tpu.memory_space<vmem>>, vector<32x4xbf16>
    %11 = arith.truncf %9 : vector<4x256xf32> to vector<4x256xbf16>
    %cst_8 = arith.constant dense<0.000000e+00> : vector<32x256xf32>
    %12 = tpu.matmul %10, %11, %cst_8 {dimension_numbers = #tpu.dot_dimension_numbers<[1], [0], [0], [1], [0, 0, 1, 1], [], []>} : vector<32x4xbf16>, vector<4x256xbf16>, vector<32x256xf32> -> vector<32x256xf32>
    %c0_9 = arith.constant 0 : index
    %c0_10 = arith.constant 0 : index
    %13 = vector.load %arg5[%c0_9, %c0_10] : memref<32x1xf32, #tpu.memory_space<vmem>>, vector<32x1xf32>
    %14 = vector.broadcast %13 : vector<32x1xf32> to vector<32x256xf32>
    %15 = arith.mulf %12, %14 : vector<32x256xf32>
    %c0_11 = arith.constant 0 : index
    %c0_12 = arith.constant 0 : index
    %16 = vector.load %arg6[%c0_11, %c0_12] : memref<32x1xf32, #tpu.memory_space<vmem>>, vector<32x1xf32>
    %17 = vector.broadcast %16 : vector<32x1xf32> to vector<32x256xf32>
    %18 = arith.addf %15, %17 : vector<32x256xf32>
    %cst_13 = arith.constant 0.000000e+00 : f32
    %19 = vector.broadcast %cst_13 : f32 to vector<32x256xf32>
    %20 = arith.maximumf %18, %19 : vector<32x256xf32>
    %c0_14 = arith.constant 0 : index
    %c0_15 = arith.constant 0 : index
    %21 = vector.load %arg7[%c0_14, %c0_15] : memref<72x32xbf16, #tpu.memory_space<vmem>>, vector<72x32xbf16>
    %22 = arith.truncf %20 : vector<32x256xf32> to vector<32x256xbf16>
    %cst_16 = arith.constant dense<0.000000e+00> : vector<72x256xf32>
    %23 = tpu.matmul %21, %22, %cst_16 {dimension_numbers = #tpu.dot_dimension_numbers<[1], [0], [0], [1], [0, 0, 1, 1], [], []>} : vector<72x32xbf16>, vector<32x256xbf16>, vector<72x256xf32> -> vector<72x256xf32>
    %cst_17 = arith.constant 0.000000e+00 : f32
    %24 = vector.broadcast %cst_17 : f32 to vector<72x17xf32>
    %25 = tpu.concatenate %24, %23, %24 in 1 : vector<72x17xf32>, vector<72x256xf32>, vector<72x17xf32> -> vector<72x290xf32>
    %26 = vector.extract_strided_slice %25 {offsets = [0, 0], sizes = [8, 256], strides = [1, 1]} : vector<72x290xf32> to vector<8x256xf32>
    %c0_18 = arith.constant 0 : index
    %c0_19 = arith.constant 0 : index
    %27 = vector.load %arg9[%c0_18, %c0_19] : memref<1x256xf32, #tpu.memory_space<vmem>>, vector<1x256xf32>
    %28 = vector.broadcast %27 : vector<1x256xf32> to vector<8x256xf32>
    %29 = arith.mulf %26, %28 : vector<8x256xf32>
    %30 = vector.extract_strided_slice %25 {offsets = [8, 1], sizes = [8, 256], strides = [1, 1]} : vector<72x290xf32> to vector<8x256xf32>
    %31 = arith.addf %29, %30 : vector<8x256xf32>
    %32 = vector.extract_strided_slice %25 {offsets = [16, 2], sizes = [8, 256], strides = [1, 1]} : vector<72x290xf32> to vector<8x256xf32>
    %c0_20 = arith.constant 0 : index
    %c0_21 = arith.constant 0 : index
    %33 = vector.load %arg10[%c0_20, %c0_21] : memref<1x256xf32, #tpu.memory_space<vmem>>, vector<1x256xf32>
    %34 = vector.broadcast %33 : vector<1x256xf32> to vector<8x256xf32>
    %35 = arith.mulf %32, %34 : vector<8x256xf32>
    %36 = arith.addf %31, %35 : vector<8x256xf32>
    %37 = vector.extract_strided_slice %25 {offsets = [24, 16], sizes = [8, 256], strides = [1, 1]} : vector<72x290xf32> to vector<8x256xf32>
    %c0_22 = arith.constant 0 : index
    %c0_23 = arith.constant 0 : index
    %38 = vector.load %arg9[%c0_22, %c0_23] : memref<1x256xf32, #tpu.memory_space<vmem>>, vector<1x256xf32>
    %39 = vector.broadcast %38 : vector<1x256xf32> to vector<8x256xf32>
    %40 = arith.mulf %37, %39 : vector<8x256xf32>
    %41 = arith.addf %36, %40 : vector<8x256xf32>
    %42 = vector.extract_strided_slice %25 {offsets = [32, 17], sizes = [8, 256], strides = [1, 1]} : vector<72x290xf32> to vector<8x256xf32>
    %43 = arith.addf %41, %42 : vector<8x256xf32>
    %44 = vector.extract_strided_slice %25 {offsets = [40, 18], sizes = [8, 256], strides = [1, 1]} : vector<72x290xf32> to vector<8x256xf32>
    %c0_24 = arith.constant 0 : index
    %c0_25 = arith.constant 0 : index
    %45 = vector.load %arg10[%c0_24, %c0_25] : memref<1x256xf32, #tpu.memory_space<vmem>>, vector<1x256xf32>
    %46 = vector.broadcast %45 : vector<1x256xf32> to vector<8x256xf32>
    %47 = arith.mulf %44, %46 : vector<8x256xf32>
    %48 = arith.addf %43, %47 : vector<8x256xf32>
    %49 = vector.extract_strided_slice %25 {offsets = [48, 32], sizes = [8, 256], strides = [1, 1]} : vector<72x290xf32> to vector<8x256xf32>
    %c0_26 = arith.constant 0 : index
    %c0_27 = arith.constant 0 : index
    %50 = vector.load %arg9[%c0_26, %c0_27] : memref<1x256xf32, #tpu.memory_space<vmem>>, vector<1x256xf32>
    %51 = vector.broadcast %50 : vector<1x256xf32> to vector<8x256xf32>
    %52 = arith.mulf %49, %51 : vector<8x256xf32>
    %53 = arith.addf %48, %52 : vector<8x256xf32>
    %54 = vector.extract_strided_slice %25 {offsets = [56, 33], sizes = [8, 256], strides = [1, 1]} : vector<72x290xf32> to vector<8x256xf32>
    %55 = arith.addf %53, %54 : vector<8x256xf32>
    %56 = vector.extract_strided_slice %25 {offsets = [64, 34], sizes = [8, 256], strides = [1, 1]} : vector<72x290xf32> to vector<8x256xf32>
    %c0_28 = arith.constant 0 : index
    %c0_29 = arith.constant 0 : index
    %57 = vector.load %arg10[%c0_28, %c0_29] : memref<1x256xf32, #tpu.memory_space<vmem>>, vector<1x256xf32>
    %58 = vector.broadcast %57 : vector<1x256xf32> to vector<8x256xf32>
    %59 = arith.mulf %56, %58 : vector<8x256xf32>
    %60 = arith.addf %55, %59 : vector<8x256xf32>
    %c0_30 = arith.constant 0 : index
    %c0_31 = arith.constant 0 : index
    %61 = vector.load %arg8[%c0_30, %c0_31] : memref<8x1xf32, #tpu.memory_space<vmem>>, vector<8x1xf32>
    %62 = vector.broadcast %61 : vector<8x1xf32> to vector<8x256xf32>
    %63 = arith.addf %60, %62 : vector<8x256xf32>
    %64 = tpu.concatenate %63, %1 in 0 : vector<8x256xf32>, vector<4x256xf32> -> vector<12x256xf32>
    %65 = vector.shape_cast %64 : vector<12x256xf32> to vector<1x12x256xf32>
    %c0_32 = arith.constant 0 : index
    %c0_33 = arith.constant 0 : index
    %c0_34 = arith.constant 0 : index
    %66 = vector.load %arg11[%c0_32, %c0_33, %c0_34] : memref<1x12x256xf32, #tpu.memory_space<vmem>>, vector<1x12x256xf32>
    tpu.vector_store %arg11[%c0_32, %c0_33, %c0_34], %65 {strides = array<i32>} : memref<1x12x256xf32, #tpu.memory_space<vmem>>, vector<1x12x256xf32>,
    return
  }
  func.func @transform_0(%arg0: i32) -> (i32, i32, i32) {
    %c0_i32 = arith.constant 0 : i32
    %c0_i32_0 = arith.constant 0 : i32
    %c0_i32_1 = arith.constant 0 : i32
    return %arg0, %c0_i32, %c0_i32_0 : i32, i32, i32
  }
  func.func @transform_1(%arg0: i32) -> (i32, i32) {
    %c0_i32 = arith.constant 0 : i32
    %c0_i32_0 = arith.constant 0 : i32
    %c0_i32_1 = arith.constant 0 : i32
    return %c0_i32, %c0_i32_0 : i32, i32
  }
  func.func @transform_2(%arg0: i32) -> (i32, i32) {
    %c0_i32 = arith.constant 0 : i32
    %c0_i32_0 = arith.constant 0 : i32
    %c0_i32_1 = arith.constant 0 : i32
    return %c0_i32, %c0_i32_0 : i32, i32
  }
  func.func @transform_3(%arg0: i32) -> (i32, i32) {
    %c0_i32 = arith.constant 0 : i32
    %c0_i32_0 = arith.constant 0 : i32
    %c0_i32_1 = arith.constant 0 : i32
    return %c0_i32, %c0_i32_0 : i32, i32
  }
  func.func @transform_4(%arg0: i32) -> (i32, i32) {
    %c0_i32 = arith.constant 0 : i32
    %c0_i32_0 = arith.constant 0 : i32
    %c0_i32_1 = arith.constant 0 : i32
    return %c0_i32, %c0_i32_0 : i32, i32
  }
  func.func @transform_5(%arg0: i32) -> (i32, i32) {
    %c0_i32 = arith.constant 0 : i32
    %c0_i32_0 = arith.constant 0 : i32
    %c0_i32_1 = arith.constant 0 : i32
    return %c0_i32, %c0_i32_0 : i32, i32
  }
  func.func @transform_6(%arg0: i32) -> (i32, i32) {
    %c0_i32 = arith.constant 0 : i32
    %c0_i32_0 = arith.constant 0 : i32
    %c0_i32_1 = arith.constant 0 : i32
    return %c0_i32, %c0_i32_0 : i32, i32
  }
  func.func @transform_7(%arg0: i32) -> (i32, i32) {
    %c0_i32 = arith.constant 0 : i32
    %c0_i32_0 = arith.constant 0 : i32
    %c0_i32_1 = arith.constant 0 : i32
    return %c0_i32, %c0_i32_0 : i32, i32
  }
  func.func @transform_8(%arg0: i32) -> (i32, i32) {
    %c0_i32 = arith.constant 0 : i32
    %c0_i32_0 = arith.constant 0 : i32
    %c0_i32_1 = arith.constant 0 : i32
    return %c0_i32, %c0_i32_0 : i32, i32
  }
  func.func @transform_9(%arg0: i32) -> (i32, i32) {
    %c0_i32 = arith.constant 0 : i32
    %c0_i32_0 = arith.constant 0 : i32
    %c0_i32_1 = arith.constant 0 : i32
    return %c0_i32, %c0_i32_0 : i32, i32
  }
  func.func @transform_10(%arg0: i32) -> (i32, i32, i32) {
    %c0_i32 = arith.constant 0 : i32
    %c0_i32_0 = arith.constant 0 : i32
    %c0_i32_1 = arith.constant 0 : i32
    return %arg0, %c0_i32, %c0_i32_0 : i32, i32, i32
  }
}

</mosaic_0001>

<bundles_post_ra>
// kernel: bottleneck_forward.1
= control target key start
LH: loop header
LB: loop body
LE: loop exit
PB: predicated region body
PF: predicated region fallthrough
CT: control target
= control target key end

     0   :  { %s1209_s13 = smov 0   ;;  %s1403_s0 = inlined_call_operand.vmem [shape: f32[2,4,256], index: 0, kind: input, shape index: {}]   ;;  %s1404_s1 = inlined_call_operand.vmem [shape: f32[4,1], index: 1, kind: input, shape index: {}]   ;;  %s1405_s2 = inlined_call_operand.vmem [shape: f32[4,1], index: 2, kind: input, shape index: {}]   ;;  %s1406_s3 = inlined_call_operand.vmem [shape: bf16[32,4], index: 3, kind: input, shape index: {}]   ;;  %s1407_s4 = inlined_call_operand.vmem [shape: f32[32,1], index: 4, kind: input, shape index: {}]   ;;  %s1408_s5 = inlined_call_operand.vmem [shape: f32[32,1], index: 5, kind: input, shape index: {}]   ;;  %s1409_s6 = inlined_call_operand.vmem [shape: bf16[72,32], index: 6, kind: input, shape index: {}]   ;;  %s1410_s7 = inlined_call_operand.vmem [shape: f32[8,1], index: 7, kind: input, shape index: {}]   ;;  %s1411_s8 = inlined_call_operand.vmem [shape: f32[1,256], index: 8, kind: input, shape index: {}]   ;;  %s1412_s9 = inlined_call_operand.vmem [shape: f32[1,256], index: 9, kind: input, shape index: {}]   ;;  %s1413_s10 = inlined_call_operand.vmem [shape: f32[2,12,256], index: 10, kind: output, shape index: {}]  }
   0x1 LB: > { %s1064_s14 = sadd.s32 4294967295, %s1136_s13   ;;  %p1068_p0 = scmp.ge.s32.totalorder %s1136_s13, 1  ;;  %s1136_s13 = sphi %s1209_s13, %s20_s13  }
   0x2   : > { %p312_p1 = scmp.lt.s32.totalorder %s1136_s13, 3 }
   0x4   : > { %p313_p2 = pnand %p1068_p0, %p312_p1 }
   0x5   : > { %p350_p3 = scmp.lt.s32.totalorder (!%p313_p2), %s1064_s14, 1  ;;  %s1141_s15 = smov (!%p313_p2), 16  }
   0x6   : > { %316 = sbr.rel (%p313_p2) target bundleno = 860 (0x35c), region = 60  ;;  %s1142_s16 = smov (!%p313_p2), 18  }
   0x7   : > { %s1143_s17 = smov (!%p313_p2), 32   ;;  %s1144_s29 = smov (!%p313_p2), 17  }
   0x8   : > { %s1145_s30 = smov (!%p313_p2), 34   ;;  %s1150_s18 = smov (!%p313_p2), 110  }
   0x9   : > { %s1153_s21 = smov (!%p313_p2), 94  }
   0xb   : > { %v362_v0 = vld [vmem:[%s1404_s1] sm:$0xf]  ;;  %v1138_v1 = vmov 0   ;;  %s1415_s14 = smov (!%p350_p3, %s1064_s14), 1  ;;  %v511_v3 = vld [vmem:[%s1408_s5 + $0x10] sm:$0xff]  ;;  %v480_v9 = vld [vmem:[%s1407_s4 + $0x18] sm:$0xff]  ;;  %v370_v15 = vlaneseq }
   0xc   : > { %1120 = vset.pattern.permute.xlu0 %v1138_v1  ;;  %456 = vmatprep.mubr.bf16.mxu0 %v1138_v1  ;;  %v376_v2 = vld [vmem:[%s1405_s2] sm:$0xf]  ;;  %s1090_s19 = sshll.u32 %s1415_s14, 3  ;;  %s1091_s20 = sshll.u32 %s1415_s14, 5  ;;  %v479_v8 = vld [vmem:[%s1407_s4 + $0x10] sm:$0xff]  ;;  %v512_v10 = vld [vmem:[%s1408_s5 + $0x18] sm:$0xff] }
   0xd   : > { %365 = vperm.xlu0 %1120, %v362_v0   ;;  %1121 = vset.pattern.permute.xlu1 %v1138_v1  ;;  %s354_s23 = scalar_lea.vmem %s1403_s0, %s1090_s19  ;;  %s1236_s28 = scalar_lea.vmem %s1413_s10, %s1091_s20  ;;  %v477_v6 = vld [vmem:[%s1407_s4] sm:$0xff]  ;;  %v478_v11 = vld [vmem:[%s1407_s4 + $0x8] sm:$0xff]  ;;  %v1139_v13 = vmov 839922192   ;;  %v371_v17 = vshrl.u32 %v370_v15, 7  ;;  %vm417_vm0 = vcmask 1041408  }
   0xe   : > { %643 = vmatprep.mubr.bf16.mxu1 %v1138_v1  ;;  %v361_v4 = vld [vmem:[%s354_s23] sm:$0xff]  ;;  %493 = vperm.xlu1 %1121, %v479_v8   ;;  %v510_v12 = vld [vmem:[%s1408_s5 + $0x8] sm:$0xff]  ;;  %v368_v14 = vunpack.c.l.s4 %v1139_v13  ;;  %vm410_vm1 = vcmask 31744   ;;  %s1140_s14 = smov 2   ;;  %vm585_vm2 = vcmask 261120   ;;  %vm736_vm3 = vcmask 138240  }
   0xf   : > { %v1003_v5 = vcombine.high %v361_v4, %v361_v4  ;;  %1007 = vst [vmem:[%s1236_s28 + $0x10] sm:$0xf] %v361_v4  ;;  %v509_v7 = vld [vmem:[%s1408_s5] sm:$0xff]  ;;  %v1124_v31 = vld [vmem:[%s1406_s3 + $0x8] sm:$0xff]   ;;  %v790_v32 = vsub.s32 0, %v371_v17  ;;  %v794_v34 = vsub.s32 1, %v371_v17 }
  0x10   : > { %v369_v16 = vunpack.c.0.s8 %v368_v14  ;;  %v1123_v30 = vld [vmem:[%s1406_s3] sm:$0xff]   ;;  %vm829_vm4 = vcmask 15360   ;;  %vm857_vm5 = vcmask 130048   ;;  %vm900_vm6 = vcmask 146432   ;;  %s1151_s19 = smov 96   ;;  %s1152_s20 = smov 95  }
  0x11   : > { %379 = vperm.xlu0 %1120, %v376_v2   ;;  %1008 = vst [vmem:[%s1236_s28 + $0x18] sm:$0xf] %v1003_v5  ;;  %v815_v33 = vld [vmem:[%s1412_s9] sm:$0x3]  ;;  %vm970_vm7 = vcmask 277504   ;;  %vm808_vm8 = vcmask 1039360  }
  0x12   : > { %498 = vperm.xlu1 %1121, %v480_v9   ;;  %v372_v18 = vsub.s32 %v369_v16, %v371_v17  ;;  %v786_v35 = vld [vmem:[%s1411_s8] sm:$0x3]  ;;  %v1275_v36 = vrot.slane %v815_v33, %v790_v32  ;;  %v1277_v37 = vrot.slane %v815_v33, %v794_v34  ;;  %vm846_vm9 = vcmask 1031168  }
  0x13   : > { %v1281_v38 = vrot.slane %v786_v35, %v790_v32  ;;  %v1283_v39 = vrot.slane %v786_v35, %v794_v34  ;;  %vm874_vm10 = vcmask 916480   ;;  %vm889_vm11 = vcmask 908288  }
  0x14   : > { %vm917_vm12 = vcmask 900096   ;;  %vm944_vm13 = vcmask 785408   ;;  %vm959_vm14 = vcmask 777216   ;;  %vm987_vm15 = vcmask 769024  }
  0x15   : > { %525 = vperm.xlu0 %1120, %v511_v3  }
  0x16   : > { %530 = vperm.xlu1 %1121, %v512_v10  }
  0x19   : > { %483 = vperm.xlu0 %1120, %v477_v6  }
  0x1a   : > { %488 = vperm.xlu1 %1121, %v478_v11  }
  0x1d   : > { %515 = vperm.xlu0 %1120, %v509_v7  }
  0x1e   : > { %520 = vperm.xlu1 %1121, %v510_v12  }
  0x21   : > { %825 = vrot.lane.b32.xlu0 %v1275_v36, %s1140_s14 }
  0x22   : > { %827 = vrot.lane.b32.xlu1 %v1277_v37, %s1140_s14  ;;  %s1146_s14 = smov 126  }
  0x25   : > { %853 = vrot.lane.b32.xlu0 %v1281_v38, %s1141_s15 }
  0x26   : > { %855 = vrot.lane.b32.xlu1 %v1283_v39, %s1141_s15  ;;  %s1147_s15 = smov 127  }
  0x29   : > { %896 = vrot.lane.b32.xlu0 %v1275_v36, %s1142_s16 }
  0x2a   : > { %898 = vrot.lane.b32.xlu1 %v1277_v37, %s1142_s16  ;;  %s1148_s16 = smov 112  }
  0x2d   : > { %924 = vrot.lane.b32.xlu0 %v1281_v38, %s1143_s17 }
  0x2e   : > { %926 = vrot.lane.b32.xlu1 %v1283_v39, %s1143_s17  ;;  %s1149_s17 = smov 111  }
  0x88   : > { %v366_v19 = vpop.permute.xlu0 %365 }
  0x89   : > { %v373_v20 = vrot.slane %v366_v19, %v372_v18  ;;  %v494_v40 = vpop.permute.xlu1 %493 }
  0x8b   : > { %v375_v22 = vmul.f32 %v373_v20, %v361_v4 }
  0x8c   : > { %v380_v21 = vpop.permute.xlu0 %379 }
  0x8d   : > { %v387_v23 = vrot.slane %v380_v21, %v372_v18  ;;  %v499_v41 = vpop.permute.xlu1 %498  ;;  %v1125_v21 = vld [vmem:[%s1409_s6] sm:$0xff]  }
  0x8f   : > { %v389_v24 = vadd.f32 %v387_v23, %v375_v22  ;;  %v1126_v22 = vld [vmem:[%s1409_s6 + $0x8] sm:$0xff]   ;;  %v1127_v23 = vld [vmem:[%s1409_s6 + $0x10] sm:$0xff]  }
  0x90   : > { %v526_v45 = vpop.permute.xlu0 %525 }
  0x91   : > { %v390_v25 = vmax.f32 %v389_v24, 0.0  ;;  %v531_v43 = vpop.permute.xlu1 %530  ;;  %v1128_v24 = vld [vmem:[%s1409_s6 + $0x18] sm:$0xff]  }
  0x93   : > { %v396_v26 = vcombine.high %v390_v25, %v390_v25  ;;  %v398_v27 = vpack.c.bf16 %v390_v25, %v390_v25  ;;  %v1129_v25 = vld [vmem:[%s1409_s6 + $0x20] ss:$0 sps:$4 sm:$0xff]  }
  0x94   : > { %v484_v50 = vpop.permute.xlu0 %483 }
  0x95   : > { %v399_v28 = vpack.c.bf16 %v396_v26, %v396_v26  ;;  %v419_v29 = vsel %vm417_vm0, %v398_v27, 0  ;;  %v489_v48 = vpop.permute.xlu1 %488 }
  0x97   : > { %1075 = vmatprep.subr.msk.bf16.mxu0 %vm417_vm0, %v399_v28 }
  0x98   : > { %439 = vmatpush1.bf16.msra.mxu0 %v419_v29  ;;  %v516_v2 = vpop.permute.xlu0 %515 }
  0x99   : > { %v521_v59 = vpop.permute.xlu1 %520 }
  0x9b   : > { %1076 = vmatmul.mubr.msk.bf16.vlgmr.msra.gmra.mxu0 %vm410_vm1, %v1123_v30 }
  0x9c   : > { %466 = vmatprep.mubr.bf16.mxu0 %v1138_v1 }
  0xa3   : > { %1077 = vmatmul.mubr.msk.bf16.gmra.mxu0 %vm410_vm1, %v1124_v31 }
  0xa4   : > { %633 = vmatprep.mubr.bf16.mxu0 %v1138_v1 }
 0x15b   : > { %v458_v42 = vpop.f32.mrf.mxu0 }
 0x15c   : > { %v501_v3 = vmul.f32 %v484_v50, %v458_v42 }
 0x15d   : > { %v460_v44 = vpop.f32.mrf.mxu0 }
 0x15e   : > { %v502_v56 = vmul.f32 %v484_v50, %v460_v44  ;;  %v533_v12 = vadd.f32 %v516_v2, %v501_v3  ;;  %v826_v50 = vpop.permute.xlu0 %825 }
 0x15f   : > { %v462_v46 = vpop.f32.mrf.mxu0 }
 0x160   : > { %v503_v58 = vmul.f32 %v489_v48, %v462_v46  ;;  %v534_v5 = vadd.f32 %v516_v2, %v502_v56  ;;  %v541_v19 = vmax.f32 %v533_v12, 0.0 }
 0x161   : > { %v464_v47 = vpop.f32.mrf.mxu0 }
 0x162   : > { %v504_v52 = vmul.f32 %v489_v48, %v464_v47  ;;  %v535_v7 = vadd.f32 %v521_v59, %v503_v58  ;;  %v542_v14 = vmax.f32 %v534_v5, 0.0 }
 0x163   : > { %v468_v49 = vpop.f32.mrf.mxu0 }
 0x164   : > { %v505_v54 = vmul.f32 %v494_v40, %v468_v49  ;;  %v536_v61 = vadd.f32 %v521_v59, %v504_v52  ;;  %v543_v16 = vmax.f32 %v535_v7, 0.0  ;;  %v994_v49 = vld [vmem:[%s1410_s7] sm:$0xff]  ;;  %v854_v52 = vpop.permute.xlu0 %853 }
 0x165   : > { %v470_v51 = vpop.f32.mrf.mxu0 }
 0x166   : > { %v506_v53 = vmul.f32 %v494_v40, %v470_v51  ;;  %v537_v4 = vadd.f32 %v526_v45, %v505_v54  ;;  %v544_v9 = vmax.f32 %v536_v61, 0.0  ;;  %v558_v20 = vpack.c.bf16 %v543_v16, %v541_v19  ;;  %v828_v51 = vpop.permute.xlu1 %827 }
 0x167   : > { %v472_v55 = vpop.f32.mrf.mxu0  ;;  %v830_v3 = vsel %vm829_vm4, %v826_v50, %v828_v51 }
 0x168   : > { %v507_v57 = vmul.f32 %v499_v41, %v472_v55  ;;  %v538_v62 = vadd.f32 %v526_v45, %v506_v53  ;;  %v545_v13 = vmax.f32 %v537_v4, 0.0  ;;  %v559_v18 = vpack.c.bf16 %v544_v9, %v542_v14  ;;  %v1337_v54 = vpop.permute.xlu0 %896 }
 0x169   : > { %v474_v60 = vpop.f32.mrf.mxu0 }
 0x16a   : > { %v539_v63 = vadd.f32 %v531_v43, %v507_v57  ;;  %v508_v0 = vmul.f32 %v499_v41, %v474_v60  ;;  %v546_v10 = vmax.f32 %v538_v62, 0.0  ;;  %v856_v53 = vpop.permute.xlu1 %855 }
 0x16c   : > { %v540_v6 = vadd.f32 %v531_v43, %v508_v0  ;;  %v547_v8 = vmax.f32 %v539_v63, 0.0 }
 0x16e   : > { %v548_v11 = vmax.f32 %v540_v6, 0.0  ;;  %v560_v17 = vpack.c.bf16 %v547_v8, %v545_v13  ;;  %v1339_v55 = vpop.permute.xlu1 %898 }
 0x170   : > { %v561_v15 = vpack.c.bf16 %v548_v11, %v546_v10  ;;  %v858_v10 = vsel %vm857_vm5, %v854_v52, %v856_v53 }
 0x172   : > { %613 = vmatprep.subr.bf16.mxu0 %v561_v15  ;;  %1092 = vmatprep.subr.bf16.mxu1 %v561_v15 }
 0x173   : > { %614 = vmatpush1.bf16.msra.mxu0 %v560_v17  ;;  %1094 = vmatpush1.bf16.msra.mxu1 %v560_v17 }
 0x174   : > { %615 = vmatprep.subr.bf16.mxu0 %v559_v18  ;;  %1093 = vmatprep.subr.bf16.mxu1 %v559_v18 }
 0x177   : > { %616 = vmatpush1.bf16.msra.mxu0 %v558_v20  ;;  %1095 = vmatpush1.bf16.msra.mxu1 %v558_v20 }
 0x17a   : > { %1083 = vmatmul.mubr.msk.bf16.vlgmr.msra.gmra.mxu0 %vm585_vm2, %v1125_v21  ;;  %1084 = vmatmul.mubr.msk.bf16.vlgmr.msra.gmra.mxu1 %vm585_vm2, %v1126_v22 }
 0x17b   : > { %653 = vmatprep.mubr.bf16.mxu1 %v1138_v1 }
 0x182   : > { %1085 = vmatmul.mubr.msk.bf16.gmra.mxu1 %vm585_vm2, %v1127_v23 }
 0x183   : > { %663 = vmatprep.mubr.bf16.mxu1 %v1138_v1 }
 0x18a   : > { %1086 = vmatmul.mubr.msk.bf16.gmra.mxu1 %vm585_vm2, %v1128_v24 }
 0x18b   : > { %673 = vmatprep.mubr.bf16.mxu1 %v1138_v1 }
 0x192   : > { %1087 = vmatmul.mubr.msk.bf16.gmra.mxu1 %vm585_vm2, %v1129_v25 }
 0x23a   : > { %v635_v26 = vpop.f32.mrf.mxu0  ;;  %v645_v27 = vpop.f32.mrf.mxu1 }
 0x23b   : > { %708 = vrot.lane.b32.xlu0 %v645_v27, %s1144_s29 }
 0x23c   : > { %v637_v28 = vpop.f32.mrf.mxu0  ;;  %v647_v29 = vpop.f32.mrf.mxu1 }
 0x23d   : > { %710 = vrot.lane.b32.xlu1 %v647_v29, %s1144_s29 }
 0x23e   : > { %v639_v30 = vpop.f32.mrf.mxu0  ;;  %v649_v31 = vpop.f32.mrf.mxu1 }
 0x23f   : > { %704 = vrot.lane.b32.xlu0 %v639_v30, %s1144_s29 }
 0x240   : > { %v641_v1 = vpop.f32.mrf.mxu0  ;;  %v651_v32 = vpop.f32.mrf.mxu1 }
 0x241   : > { %706 = vrot.lane.b32.xlu1 %v641_v1, %s1144_s29 }
 0x242   : > { %v655_v33 = vpop.f32.mrf.mxu1 }
 0x243   : > { %712 = vrot.lane.b32.xlu0 %v649_v31, %s1144_s29 }
 0x244   : > { %v657_v34 = vpop.f32.mrf.mxu1 }
 0x245   : > { %714 = vrot.lane.b32.xlu1 %v651_v32, %s1144_s29 }
 0x246   : > { %v659_v35 = vpop.f32.mrf.mxu1 }
 0x247   : > { %716 = vrot.lane.b32.xlu0 %v655_v33, %s1144_s29 }
 0x248   : > { %v661_v40 = vpop.f32.mrf.mxu1 }
 0x249   : > { %718 = vrot.lane.b32.xlu1 %v657_v34, %s1144_s29 }
 0x24a   : > { %v665_v41 = vpop.f32.mrf.mxu1 }
 0x24b   : > { %720 = vrot.lane.b32.xlu0 %v659_v35, %s1144_s29 }
 0x24c   : > { %v667_v42 = vpop.f32.mrf.mxu1 }
 0x24d   : > { %722 = vrot.lane.b32.xlu1 %v661_v40, %s1144_s29 }
 0x24e   : > { %v669_v43 = vpop.f32.mrf.mxu1 }
 0x24f   : > { %724 = vrot.lane.b32.xlu0 %v665_v41, %s1144_s29 }
 0x250   : > { %v671_v44 = vpop.f32.mrf.mxu1 }
 0x251   : > { %726 = vrot.lane.b32.xlu1 %v667_v42, %s1144_s29 }
 0x252   : > { %v675_v45 = vpop.f32.mrf.mxu1 }
 0x253   : > { %728 = vrot.lane.b32.xlu0 %v669_v43, %s1144_s29 }
 0x254   : > { %v677_v46 = vpop.f32.mrf.mxu1 }
 0x255   : > { %730 = vrot.lane.b32.xlu1 %v671_v44, %s1144_s29 }
 0x256   : > { %v679_v47 = vpop.f32.mrf.mxu1 }
 0x257   : > { %732 = vrot.lane.b32.xlu0 %v675_v45, %s1144_s29 }
 0x258   : > { %v680_v48 = vpop.f32.mrf.mxu1 }
 0x259   : > { %734 = vrot.lane.b32.xlu1 %v677_v46, %s1144_s29 }
 0x25b   : > { %966 = vrot.lane.b32.xlu0 %v1275_v36, %s1145_s30  ;;  %v1341_v36 = vpop.permute.xlu0 %924 }
 0x25d   : > { %968 = vrot.lane.b32.xlu1 %v1277_v37, %s1145_s30  ;;  %v1343_v37 = vpop.permute.xlu1 %926 }
 0x25e   : > { %v928_v44 = vsel %vm585_vm2, %v1341_v36, %v1343_v37 }
 0x25f   : > { %700 = vrot.lane.b32.xlu0 %v635_v26, %s1144_s29  ;;  %v901_v26 = vsel %vm900_vm6, %v1337_v54, %v1339_v55 }
 0x261   : > { %702 = vrot.lane.b32.xlu1 %v637_v28, %s1144_s29 }
 0x265   : > { %997 = vperm.xlu1 %1121, %v994_v49  }
 0x2ad   : > { %v709_v56 = vpop.permute.xlu0 %708 }
 0x2ae   : > { %v771_v57 = vsel %vm736_vm3, 0.0, %v709_v56 }
 0x2af   : > { %v834_v58 = vmul.f32 %v826_v50, %v771_v57  ;;  %v711_v59 = vpop.permute.xlu1 %710 }
 0x2b0   : > { %v779_v60 = vsel %vm736_vm3, %v711_v59, 0.0  ;;  %v739_v62 = vsel %vm736_vm3, %v709_v56, %v711_v59 }
 0x2b1   : > { %v705_v61 = vpop.permute.xlu0 %704  ;;  %840 = vrot.lane.b32.xlu1 %v834_v58, %s1146_s14  ;;  %v836_v0 = vmul.f32 %v828_v51, %v779_v60  ;;  %v835_v4 = vmul.f32 %v830_v3, %v739_v62 }
 0x2b2   : > { %v770_v63 = vsel %vm736_vm3, 0.0, %v705_v61 }
 0x2b3   : > { %802 = vrot.lane.b32.xlu0 %v770_v63, %s1147_s15  ;;  %v707_v2 = vpop.permute.xlu1 %706 }
 0x2b4   : > { %v738_v8 = vsel %vm736_vm3, %v705_v61, %v707_v2  ;;  %v778_v12 = vsel %vm736_vm3, %v707_v2, 0.0 }
 0x2b5   : > { %v713_v5 = vpop.permute.xlu0 %712  ;;  %844 = vrot.lane.b32.xlu1 %v836_v0, %s1146_s14 }
 0x2b6   : > { %v772_v11 = vsel %vm736_vm3, 0.0, %v713_v5 }
 0x2b7   : > { %842 = vrot.lane.b32.xlu0 %v835_v4, %s1146_s14  ;;  %v715_v6 = vpop.permute.xlu1 %714  ;;  %v862_v15 = vmul.f32 %v854_v52, %v772_v11 }
 0x2b8   : > { %v740_v7 = vsel %vm736_vm3, %v713_v5, %v715_v6  ;;  %v780_v17 = vsel %vm736_vm3, %v715_v6, 0.0 }
 0x2b9   : > { %v717_v9 = vpop.permute.xlu0 %716  ;;  %804 = vrot.lane.b32.xlu1 %v738_v8, %s1147_s15  ;;  %v863_v13 = vmul.f32 %v858_v10, %v740_v7  ;;  %v864_v20 = vmul.f32 %v856_v53, %v780_v17 }
 0x2ba   : > { %v773_v18 = vsel %vm736_vm3, 0.0, %v717_v9 }
 0x2bb   : > { %806 = vrot.lane.b32.xlu0 %v778_v12, %s1147_s15  ;;  %v719_v14 = vpop.permute.xlu1 %718 }
 0x2bc   : > { %v781_v22 = vsel %vm736_vm3, %v719_v14, 0.0  ;;  %v741_v28 = vsel %vm736_vm3, %v717_v9, %v719_v14 }
 0x2bd   : > { %v721_v16 = vpop.permute.xlu0 %720  ;;  %870 = vrot.lane.b32.xlu1 %v863_v13, %s1148_s16 }
 0x2be   : > { %v774_v27 = vsel %vm736_vm3, 0.0, %v721_v16 }
 0x2bf   : > { %868 = vrot.lane.b32.xlu0 %v862_v15, %s1148_s16  ;;  %v723_v19 = vpop.permute.xlu1 %722  ;;  %v905_v1 = vmul.f32 %v1337_v54, %v774_v27 }
 0x2c0   : > { %v742_v24 = vsel %vm736_vm3, %v721_v16, %v723_v19  ;;  %v782_v32 = vsel %vm736_vm3, %v723_v19, 0.0 }
 0x2c1   : > { %v725_v21 = vpop.permute.xlu0 %724  ;;  %883 = vrot.lane.b32.xlu1 %v773_v18, %s1149_s17  ;;  %v906_v29 = vmul.f32 %v901_v26, %v742_v24  ;;  %v907_v41 = vmul.f32 %v1339_v55, %v782_v32 }
 0x2c2   : > { %v775_v31 = vsel %vm736_vm3, 0.0, %v725_v21 }
 0x2c3   : > { %872 = vrot.lane.b32.xlu0 %v864_v20, %s1148_s16  ;;  %v727_v23 = vpop.permute.xlu1 %726  ;;  %v932_v33 = vmul.f32 %v1341_v36, %v775_v31 }
 0x2c4   : > { %v783_v40 = vsel %vm736_vm3, %v727_v23, 0.0  ;;  %v743_v42 = vsel %vm736_vm3, %v725_v21, %v727_v23 }
 0x2c5   : > { %v729_v25 = vpop.permute.xlu0 %728  ;;  %887 = vrot.lane.b32.xlu1 %v781_v22, %s1149_s17  ;;  %v934_v43 = vmul.f32 %v1343_v37, %v783_v40  ;;  %v933_v45 = vmul.f32 %v928_v44, %v743_v42 }
 0x2c6   : > { %v776_v52 = vsel %vm736_vm3, 0.0, %v729_v25 }
 0x2c7   : > { %885 = vrot.lane.b32.xlu0 %v741_v28, %s1149_s17  ;;  %v731_v30 = vpop.permute.xlu1 %730 }
 0x2c8   : > { %v744_v50 = vsel %vm736_vm3, %v729_v25, %v731_v30  ;;  %v784_v54 = vsel %vm736_vm3, %v731_v30, 0.0 }
 0x2c9   : > { %913 = vrot.lane.b32.xlu1 %v906_v29, %s1150_s18  ;;  %v733_v34 = vpop.permute.xlu0 %732 }
 0x2ca   : > { %v777_v53 = vsel %vm736_vm3, 0.0, %v733_v34 }
 0x2cb   : > { %911 = vrot.lane.b32.xlu0 %v905_v1, %s1150_s18  ;;  %v735_v35 = vpop.permute.xlu1 %734 }
 0x2cc   : > { %v745_v48 = vsel %vm736_vm3, %v733_v34, %v735_v35  ;;  %v785_v36 = vsel %vm736_vm3, %v735_v35, 0.0 }
 0x2cd   : > { %938 = vrot.lane.b32.xlu1 %v932_v33, %s1151_s19  ;;  %v967_v46 = vpop.permute.xlu0 %966 }
 0x2ce   : > { %v975_v55 = vmul.f32 %v967_v46, %v777_v53 }
 0x2cf   : > { %915 = vrot.lane.b32.xlu0 %v907_v41, %s1150_s18  ;;  %v969_v47 = vpop.permute.xlu1 %968 }
 0x2d0   : > { %v971_v49 = vsel %vm970_vm7, %v967_v46, %v969_v47  ;;  %v977_v37 = vmul.f32 %v969_v47, %v785_v36 }
 0x2d1   : > { %942 = vrot.lane.b32.xlu1 %v934_v43, %s1151_s19  ;;  %v976_v51 = vmul.f32 %v971_v49, %v745_v48  ;;  %v701_v58 = vpop.permute.xlu0 %700 }
 0x2d2   : > { %v769_v10 = vsel %vm736_vm3, 0.0, %v701_v58 }
 0x2d3   : > { %940 = vrot.lane.b32.xlu0 %v933_v45, %s1151_s19  ;;  %v703_v56 = vpop.permute.xlu1 %702  ;;  %v798_v12 = vmul.f32 %v1281_v38, %v769_v10 }
 0x2d4   : > { %v737_v15 = vsel %vm736_vm3, %v701_v58, %v703_v56 }
 0x2d5   : > { %955 = vrot.lane.b32.xlu1 %v744_v50, %s1152_s20  ;;  %v799_v18 = vmul.f32 %v1283_v39, %v737_v15 }
 0x2d7   : > { %953 = vrot.lane.b32.xlu0 %v776_v52, %s1152_s20 }
 0x2d9   : > { %983 = vrot.lane.b32.xlu1 %v976_v51, %s1153_s21 }
 0x2db   : > { %957 = vrot.lane.b32.xlu0 %v784_v54, %s1152_s20 }
 0x2df   : > { %981 = vrot.lane.b32.xlu0 %v975_v55, %s1153_s21 }
 0x2e0   : > { %v1378_v57 = vpop.permute.xlu1 %997 }
 0x2e3   : > { %985 = vrot.lane.b32.xlu0 %v977_v37, %s1153_s21 }
 0x323   : > { %v841_v59 = vpop.permute.xlu1 %840 }
 0x325   : > { %v803_v60 = vpop.permute.xlu0 %802 }
 0x327   : > { %v845_v61 = vpop.permute.xlu1 %844 }
 0x329   : > { %v843_v62 = vpop.permute.xlu0 %842 }
 0x32a   : > { %v847_v20 = vsel %vm846_vm9, %v841_v59, %v843_v62  ;;  %v848_v27 = vsel %vm846_vm9, %v843_v62, %v845_v61 }
 0x32b   : > { %v805_v63 = vpop.permute.xlu1 %804 }
 0x32c   : > { %v809_v11 = vsel %vm808_vm8, %v803_v60, %v805_v63 }
 0x32d   : > { %v807_v0 = vpop.permute.xlu0 %806  ;;  %v813_v16 = vadd.f32 %v809_v11, %v798_v12 }
 0x32e   : > { %v810_v17 = vsel %vm808_vm8, %v805_v63, %v807_v0 }
 0x32f   : > { %v871_v2 = vpop.permute.xlu1 %870  ;;  %v814_v22 = vadd.f32 %v810_v17, %v799_v18  ;;  %v851_v23 = vadd.f32 %v847_v20, %v813_v16 }
 0x331   : > { %v869_v3 = vpop.permute.xlu0 %868  ;;  %v852_v29 = vadd.f32 %v848_v27, %v814_v22 }
 0x332   : > { %v875_v21 = vsel %vm874_vm10, %v869_v3, %v871_v2 }
 0x333   : > { %v884_v4 = vpop.permute.xlu1 %883  ;;  %v879_v25 = vadd.f32 %v875_v21, %v851_v23 }
 0x335   : > { %v873_v5 = vpop.permute.xlu0 %872 }
 0x336   : > { %v876_v28 = vsel %vm874_vm10, %v871_v2, %v873_v5 }
 0x337   : > { %v888_v6 = vpop.permute.xlu1 %887  ;;  %v880_v32 = vadd.f32 %v876_v28, %v852_v29 }
 0x339   : > { %v886_v7 = vpop.permute.xlu0 %885 }
 0x33a   : > { %v890_v24 = vsel %vm889_vm11, %v884_v4, %v886_v7  ;;  %v891_v31 = vsel %vm889_vm11, %v886_v7, %v888_v6 }
 0x33b   : > { %v914_v8 = vpop.permute.xlu1 %913  ;;  %v894_v30 = vadd.f32 %v890_v24, %v879_v25  ;;  %v895_v42 = vadd.f32 %v891_v31, %v880_v32 }
 0x33d   : > { %v912_v9 = vpop.permute.xlu0 %911 }
 0x33e   : > { %v918_v39 = vsel %vm917_vm12, %v912_v9, %v914_v8 }
 0x33f   : > { %v939_v13 = vpop.permute.xlu1 %938  ;;  %v922_v33 = vadd.f32 %v918_v39, %v894_v30 }
 0x341   : > { %v916_v14 = vpop.permute.xlu0 %915 }
 0x342   : > { %v919_v40 = vsel %vm917_vm12, %v914_v8, %v916_v14 }
 0x343   : > { %v943_v38 = vpop.permute.xlu1 %942  ;;  %v923_v45 = vadd.f32 %v919_v40, %v895_v42 }
 0x345   : > { %v941_v19 = vpop.permute.xlu0 %940 }
 0x346   : > { %v945_v1 = vsel %vm944_vm13, %v939_v13, %v941_v19  ;;  %v946_v44 = vsel %vm944_vm13, %v941_v19, %v943_v38 }
 0x347   : > { %v956_v34 = vpop.permute.xlu1 %955  ;;  %v949_v43 = vadd.f32 %v945_v1, %v922_v33  ;;  %v950_v51 = vadd.f32 %v946_v44, %v923_v45 }
 0x349   : > { %v954_v26 = vpop.permute.xlu0 %953 }
 0x34a   : > { %v960_v41 = vsel %vm959_vm14, %v954_v26, %v956_v34 }
 0x34b   : > { %v964_v46 = vadd.f32 %v960_v41, %v949_v43  ;;  %v984_v48 = vpop.permute.xlu1 %983 }
 0x34d   : > { %v958_v35 = vpop.permute.xlu0 %957 }
 0x34e   : > { %v961_v49 = vsel %vm959_vm14, %v956_v34, %v958_v35 }
 0x34f   : > { %v965_v53 = vadd.f32 %v961_v49, %v950_v51 }
 0x351   : > { %v982_v47 = vpop.permute.xlu0 %981 }
 0x352   : > { %v988_v50 = vsel %vm987_vm15, %v982_v47, %v984_v48 }
 0x353   : > { %v992_v52 = vadd.f32 %v988_v50, %v964_v46 }
 0x355   : > { %v1000_v54 = vadd.f32 %v1378_v57, %v992_v52  ;;  %v986_v55 = vpop.permute.xlu0 %985 }
 0x356   : > { %v989_v36 = vsel %vm987_vm15, %v984_v48, %v986_v55 }
 0x357   : > { %1005 = vst [vmem:[%s1236_s28] sm:$0xff] %v1000_v54  ;;  %v993_v37 = vadd.f32 %v989_v36, %v965_v53 }
 0x359   : > { %v1001_v56 = vadd.f32 %v1378_v57, %v993_v37 }
 0x35b   : > { %1006 = vst [vmem:[%s1236_s28 + $0x8] sm:$0xff] %v1001_v56 }
 0x35c PF: > { %s20_s13 = sadd.s32 1, %s1136_s13  }
 0x35d   : > { %p17_p4 = scmp.ge.s32.totalorder %s20_s13, 4  }
 0x35f   :  { %19 = sbr.rel (!%p17_p4) target bundleno = 1 (0x1), region = 90 }

</bundles_post_ra>
